<compile_context>
chip_gen: v5e
topology: v5e:2x2
jax: 0.10.0
libtpu: 0.0.40
codegen_flags: <defaults>
</compile_context>

<pallas_src>
import math

import jax
import jax.numpy as jnp
import numpy as np
from jax.experimental import pallas as pl
from jax.experimental.pallas import tpu as pltpu

LANE = 128  # TPU lane width: atoms and q outputs are padded to this.


def _vmem_spec():
    # Whole array resident in VMEM (all shapes here are tiny, single grid point).
    return pl.BlockSpec(memory_space=pltpu.MemorySpace.VMEM)


# ------------------------------- fused kernel ------------------------------

def make_fused_kernel(out_dim, atom_size, batch):
    """feature trunk + all dueling-distributional heads in one kernel."""
    H = len(out_dim)
    N = atom_size
    NP = LANE

    def kernel(x_ref, fw_ref, fb_ref, sup_ref, *rest):
        head_refs = rest[: 4 * H]      # per head: (W1, b1, W2, b2)
        out_refs = rest[4 * H:]        # per head: (B, 128) q slab

        # Shared feature trunk: relu(x @ W + b). Computed once, stays resident.
        f = jnp.maximum(
            jnp.dot(x_ref[...], fw_ref[...], preferred_element_type=jnp.float32)
            + fb_ref[...],
            0.0,
        )

        sup = sup_ref[...]                                            # (1, NP), 0 past N
        lane_mask = jax.lax.broadcasted_iota(jnp.int32, (1, NP), 1) < N

        for h in range(H):
            A = out_dim[h]
            w1, b1, w2, b2 = head_refs[4 * h: 4 * h + 4]

            # adv-hidden | val-hidden fused into one dot: (B, 2*hidden)
            hid = jnp.maximum(
                jnp.dot(f, w1[...], preferred_element_type=jnp.float32) + b1[...],
                0.0,
            )
            # adv (per-action, 128-lane padded) and val fused via block-diagonal W2:
            # out = [adv_a0 | adv_a1 | ... | val], each block 128 lanes wide.
            out = jnp.dot(hid, w2[...], preferred_element_type=jnp.float32) + b2[...]

            adv = [out[:, a * NP:(a + 1) * NP] for a in range(A)]     # tile-aligned views
            val = out[:, A * NP:(A + 1) * NP]

            adv_mean = adv[0]
            for a in range(1, A):
                adv_mean = adv_mean + adv[a]
            adv_mean = adv_mean * (1.0 / A)                           # mean over actions

            q_cols = []
            for a in range(A):
                q_atoms = val + adv[a] - adv_mean                     # (B, NP)
                q_atoms = jnp.where(lane_mask, q_atoms, -1e30)        # mask padded lanes
                m = jnp.max(q_atoms, axis=-1, keepdims=True)
                e = jnp.exp(q_atoms - m)                              # padded lanes -> 0
                dist = e / jnp.sum(e, axis=-1, keepdims=True)         # softmax(dim=-1)
                dist = jnp.maximum(dist, 0.001)                       # clamp(min=0.001)
                # padded lanes get clamped to 0.001 but support there is 0.
                q_cols.append(jnp.sum(dist * sup, axis=-1, keepdims=True))
            q_cols.append(jnp.zeros((batch, NP - A), jnp.float32))
            out_refs[h][...] = jnp.concatenate(q_cols, axis=1)        # lane-dense (B, 128)

    return kernel


# ------------------------------- wrapper -----------------------------------

def _pack_head_params(h, A, N, hidden):
    """Pack one head's 4 NoisyLinear layers into two wide weight matrices."""
    NP = LANE
    w1 = jnp.concatenate([h["wah"], h["wvh"]], axis=1)                # (hidden, 2*hidden)
    b1 = jnp.concatenate([h["bah"], h["bvh"]], axis=1)                # (1, 2*hidden)
    # Block-diagonal output weights, atoms padded to 128 lanes per action (+ val block).
    w2 = jnp.zeros((2 * hidden, (A + 1) * NP), jnp.float32)
    b2 = jnp.zeros((1, (A + 1) * NP), jnp.float32)
    for a in range(A):
        w2 = w2.at[:hidden, a * NP:a * NP + N].set(h["wa"][:, a * N:(a + 1) * N])
        b2 = b2.at[:, a * NP:a * NP + N].set(h["ba"][:, a * N:(a + 1) * N])
    w2 = w2.at[hidden:, A * NP:A * NP + N].set(h["wv"])
    b2 = b2.at[:, A * NP:A * NP + N].set(h["bv"])
    return w1, b1, w2, b2


def rainbow_forward(x, params, support, out_dim, atom_size):
    B = x.shape[0]
    hidden = params["feat_w"].shape[1]
    H = len(out_dim)
    NP = LANE

    sup_pad = jnp.zeros((1, NP), jnp.float32).at[0, :atom_size].set(
        support.astype(jnp.float32))

    head_args = []
    for i, A in enumerate(out_dim):
        head_args.extend(_pack_head_params(params["heads"][i], A, atom_size, hidden))

    kernel = make_fused_kernel(tuple(out_dim), atom_size, B)
    out_shapes = tuple(jax.ShapeDtypeStruct((B, NP), jnp.float32) for _ in out_dim)

    # TODO(synk): on v7x a ("parallel",) grid over heads could use both TensorCores,
    # but the heads have heterogeneous shapes; left as a single grid point.
    q_pad = pl.pallas_call(
        kernel,
        out_shape=out_shapes,
        in_specs=[_vmem_spec()] * (4 + 4 * H),
        out_specs=tuple(_vmem_spec() for _ in out_dim),
    )(x, params["feat_w"], params["feat_b"], sup_pad, *head_args)

    return [q_pad[i][:, :A] for i, A in enumerate(out_dim)]


# ----------------------- deterministic parameter init ----------------------

def _scale_noise(key, size):
    x = jax.random.normal(key, (size,), dtype=jnp.float32)
    return jnp.sign(x) * jnp.sqrt(jnp.abs(x))


def noisy_linear_params(key, in_f, out_f, std_init=0.5):
    """Effective (W, b) of a NoisyLinear layer: mu + sigma * epsilon."""
    k1, k2, k3, k4 = jax.random.split(key, 4)
    mu_range = 1.0 / math.sqrt(in_f)
    w_mu = jax.random.uniform(k1, (out_f, in_f), jnp.float32,
                              minval=-mu_range, maxval=mu_range)
    w_sigma = jnp.full((out_f, in_f), std_init / math.sqrt(in_f), jnp.float32)
    b_mu = jax.random.uniform(k2, (out_f,), jnp.float32,
                              minval=-mu_range, maxval=mu_range)
    b_sigma = jnp.full((out_f,), std_init / math.sqrt(out_f), jnp.float32)
    eps_in = _scale_noise(k3, in_f)
    eps_out = _scale_noise(k4, out_f)
    w = w_mu + w_sigma * jnp.outer(eps_out, eps_in)    # (out, in)
    b = b_mu + b_sigma * eps_out
    return w.T, b.reshape(1, out_f)                    # stored (in, out), (1, out)


def linear_params(key, in_f, out_f):
    k1, k2 = jax.random.split(key)
    bound = 1.0 / math.sqrt(in_f)
    w = jax.random.uniform(k1, (out_f, in_f), jnp.float32, -bound, bound)
    b = jax.random.uniform(k2, (out_f,), jnp.float32, -bound, bound)
    return w.T, b.reshape(1, out_f)


def init_network_params(key, in_dim, hidden, out_dim, atom_size):
    keys = jax.random.split(key, 1 + 4 * len(out_dim))
    feat_w, feat_b = linear_params(keys[0], in_dim, hidden)
    heads = []
    for i, A in enumerate(out_dim):
        k0, k1, k2, k3 = keys[1 + 4 * i: 5 + 4 * i]
        wah, bah = noisy_linear_params(k0, hidden, hidden)
        wa, ba = noisy_linear_params(k1, hidden, A * atom_size)
        wvh, bvh = noisy_linear_params(k2, hidden, hidden)
        wv, bv = noisy_linear_params(k3, hidden, atom_size)
        heads.append(dict(wah=wah, bah=bah, wa=wa, ba=ba,
                          wvh=wvh, bvh=bvh, wv=wv, bv=bv))
    return dict(feat_w=feat_w, feat_b=feat_b, heads=heads)


# ------------------------------- reference ---------------------------------

def reference_forward(x, params, support, out_dim, atom_size):
    feat = jnp.maximum(x @ params["feat_w"] + params["feat_b"], 0.0)
    qs = []
    for i, A in enumerate(out_dim):
        h = params["heads"][i]
        adv_hid = jnp.maximum(feat @ h["wah"] + h["bah"], 0.0)
        val_hid = jnp.maximum(feat @ h["wvh"] + h["bvh"], 0.0)
        adv = (adv_hid @ h["wa"] + h["ba"]).reshape(-1, A, atom_size)
        val = (val_hid @ h["wv"] + h["bv"]).reshape(-1, 1, atom_size)
        q_atoms = val + adv - adv.mean(axis=1, keepdims=True)
        dist = jax.nn.softmax(q_atoms, axis=-1)
        dist = jnp.maximum(dist, 0.001)
        qs.append(jnp.sum(dist * support[None, None, :], axis=2))
    return qs


# --------------------------------- main -------------------------------------

if __name__ == "__main__":
    B, in_dim, hidden = 8, 16, 32
    out_dim = [3, 4]            # two action heads, like the ModuleList in Network
    atom_size = 51              # C51 atoms
    support = jnp.linspace(0.0, 200.0, atom_size, dtype=jnp.float32)

    key = jax.random.PRNGKey(0)
    k_param, k_x = jax.random.split(key)
    params = init_network_params(k_param, in_dim, hidden, out_dim, atom_size)
    x = jax.random.normal(k_x, (B, in_dim), dtype=jnp.float32)

    q_values = rainbow_forward(x, params, support, out_dim, atom_size)
    q_values = [jax.block_until_ready(q) for q in q_values]

    q_ref = reference_forward(x, params, support, out_dim, atom_size)
    for q_k, q_r, A in zip(q_values, q_ref, out_dim):
        assert q_k.shape == (B, A), (q_k.shape, (B, A))
        np.testing.assert_allclose(np.asarray(q_k), np.asarray(q_r),
                                   rtol=1e-4, atol=1e-4)

    print("KERNEL_OK")
</pallas_src>

<mosaic_0001>
module attributes {stable_mosaic.version = 11 : i64} {
  func.func @kernel(%arg0: memref<8x16xf32, #tpu.memory_space<vmem>>, %arg1: memref<16x32xf32, #tpu.memory_space<vmem>>, %arg2: memref<1x32xf32, #tpu.memory_space<vmem>>, %arg3: memref<1x128xf32, #tpu.memory_space<vmem>>, %arg4: memref<32x64xf32, #tpu.memory_space<vmem>>, %arg5: memref<1x64xf32, #tpu.memory_space<vmem>>, %arg6: memref<64x512xf32, #tpu.memory_space<vmem>>, %arg7: memref<1x512xf32, #tpu.memory_space<vmem>>, %arg8: memref<32x64xf32, #tpu.memory_space<vmem>>, %arg9: memref<1x64xf32, #tpu.memory_space<vmem>>, %arg10: memref<64x640xf32, #tpu.memory_space<vmem>>, %arg11: memref<1x640xf32, #tpu.memory_space<vmem>>, %arg12: memref<8x128xf32, #tpu.memory_space<vmem>>, %arg13: memref<8x128xf32, #tpu.memory_space<vmem>>) attributes {dimension_semantics = [], scalar_prefetch = 0 : i64, scratch_operands = 0 : i64, tpu.core_type = #tpu.core_type<tc>} {
    %c0 = arith.constant 0 : index
    %c0_0 = arith.constant 0 : index
    %0 = vector.load %arg0[%c0, %c0_0] : memref<8x16xf32, #tpu.memory_space<vmem>>, vector<8x16xf32>
    %c0_1 = arith.constant 0 : index
    %c0_2 = arith.constant 0 : index
    %1 = vector.load %arg1[%c0_1, %c0_2] : memref<16x32xf32, #tpu.memory_space<vmem>>, vector<16x32xf32>
    %cst = arith.constant dense<0.000000e+00> : vector<8x32xf32>
    %2 = tpu.matmul %0, %1, %cst {dimension_numbers = #tpu.dot_dimension_numbers<[1], [0], [0], [1], [0, 0, 1, 1], [], []>} : vector<8x16xf32>, vector<16x32xf32>, vector<8x32xf32> -> vector<8x32xf32>
    %c0_3 = arith.constant 0 : index
    %c0_4 = arith.constant 0 : index
    %3 = vector.load %arg2[%c0_3, %c0_4] : memref<1x32xf32, #tpu.memory_space<vmem>>, vector<1x32xf32>
    %4 = vector.broadcast %3 : vector<1x32xf32> to vector<8x32xf32>
    %5 = arith.addf %2, %4 : vector<8x32xf32>
    %cst_5 = arith.constant 0.000000e+00 : f32
    %6 = vector.broadcast %cst_5 : f32 to vector<8x32xf32>
    %7 = arith.maximumf %5, %6 : vector<8x32xf32>
    %c0_6 = arith.constant 0 : index
    %c0_7 = arith.constant 0 : index
    %8 = vector.load %arg3[%c0_6, %c0_7] : memref<1x128xf32, #tpu.memory_space<vmem>>, vector<1x128xf32>
    %9 = tpu.iota {dimensions = array<i32: 1>} : vector<1x128xi32>
    %c51_i32 = arith.constant 51 : i32
    %10 = vector.broadcast %c51_i32 : i32 to vector<1x128xi32>
    %11 = arith.cmpi slt, %9, %10 : vector<1x128xi32>
    %c0_8 = arith.constant 0 : index
    %c0_9 = arith.constant 0 : index
    %12 = vector.load %arg4[%c0_8, %c0_9] : memref<32x64xf32, #tpu.memory_space<vmem>>, vector<32x64xf32>
    %cst_10 = arith.constant dense<0.000000e+00> : vector<8x64xf32>
    %13 = tpu.matmul %7, %12, %cst_10 {dimension_numbers = #tpu.dot_dimension_numbers<[1], [0], [0], [1], [0, 0, 1, 1], [], []>} : vector<8x32xf32>, vector<32x64xf32>, vector<8x64xf32> -> vector<8x64xf32>
    %c0_11 = arith.constant 0 : index
    %c0_12 = arith.constant 0 : index
    %14 = vector.load %arg5[%c0_11, %c0_12] : memref<1x64xf32, #tpu.memory_space<vmem>>, vector<1x64xf32>
    %15 = vector.broadcast %14 : vector<1x64xf32> to vector<8x64xf32>
    %16 = arith.addf %13, %15 : vector<8x64xf32>
    %cst_13 = arith.constant 0.000000e+00 : f32
    %17 = vector.broadcast %cst_13 : f32 to vector<8x64xf32>
    %18 = arith.maximumf %16, %17 : vector<8x64xf32>
    %c0_14 = arith.constant 0 : index
    %c0_15 = arith.constant 0 : index
    %19 = vector.load %arg6[%c0_14, %c0_15] : memref<64x512xf32, #tpu.memory_space<vmem>>, vector<64x512xf32>
    %cst_16 = arith.constant dense<0.000000e+00> : vector<8x512xf32>
    %20 = tpu.matmul %18, %19, %cst_16 {dimension_numbers = #tpu.dot_dimension_numbers<[1], [0], [0], [1], [0, 0, 1, 1], [], []>} : vector<8x64xf32>, vector<64x512xf32>, vector<8x512xf32> -> vector<8x512xf32>
    %c0_17 = arith.constant 0 : index
    %c0_18 = arith.constant 0 : index
    %21 = vector.load %arg7[%c0_17, %c0_18] : memref<1x512xf32, #tpu.memory_space<vmem>>, vector<1x512xf32>
    %22 = vector.broadcast %21 : vector<1x512xf32> to vector<8x512xf32>
    %23 = arith.addf %20, %22 : vector<8x512xf32>
    %24 = vector.extract_strided_slice %23 {offsets = [0, 0], sizes = [8, 128], strides = [1, 1]} : vector<8x512xf32> to vector<8x128xf32>
    %25 = vector.extract_strided_slice %23 {offsets = [0, 128], sizes = [8, 128], strides = [1, 1]} : vector<8x512xf32> to vector<8x128xf32>
    %26 = vector.extract_strided_slice %23 {offsets = [0, 256], sizes = [8, 128], strides = [1, 1]} : vector<8x512xf32> to vector<8x128xf32>
    %27 = vector.extract_strided_slice %23 {offsets = [0, 384], sizes = [8, 128], strides = [1, 1]} : vector<8x512xf32> to vector<8x128xf32>
    %28 = arith.addf %24, %25 : vector<8x128xf32>
    %29 = arith.addf %28, %26 : vector<8x128xf32>
    %cst_19 = arith.constant 0.333333343 : f32
    %30 = vector.broadcast %cst_19 : f32 to vector<8x128xf32>
    %31 = arith.mulf %29, %30 : vector<8x128xf32>
    %32 = arith.addf %27, %24 : vector<8x128xf32>
    %33 = arith.subf %32, %31 : vector<8x128xf32>
    %cst_20 = arith.constant -1.000000e+30 : f32
    %34 = vector.shape_cast %11 : vector<1x128xi1> to vector<1x128xi1>
    %35 = vector.broadcast %34 : vector<1x128xi1> to vector<8x128xi1>
    %36 = vector.broadcast %cst_20 : f32 to vector<8x128xf32>
    %37 = arith.select %35, %33, %36 : vector<8x128xi1>, vector<8x128xf32>
    %cst_21 = arith.constant dense<0xFF800000> : vector<8xf32>
    %38 = vector.multi_reduction <maximumf>, %37, %cst_21 [1] : vector<8x128xf32> to vector<8xf32>
    %39 = vector.shape_cast %38 : vector<8xf32> to vector<8x1xf32>
    %40 = vector.broadcast %39 : vector<8x1xf32> to vector<8x128xf32>
    %41 = arith.subf %37, %40 : vector<8x128xf32>
    %42 = math.exp %41 : vector<8x128xf32>
    %cst_22 = arith.constant dense<0.000000e+00> : vector<8xf32>
    %43 = vector.multi_reduction <add>, %42, %cst_22 [1] : vector<8x128xf32> to vector<8xf32>
    %44 = vector.shape_cast %43 : vector<8xf32> to vector<8x1xf32>
    %45 = vector.broadcast %44 : vector<8x1xf32> to vector<8x128xf32>
    %46 = arith.divf %42, %45 : vector<8x128xf32>
    %cst_23 = arith.constant 1.000000e-03 : f32
    %47 = vector.broadcast %cst_23 : f32 to vector<8x128xf32>
    %48 = arith.maximumf %46, %47 : vector<8x128xf32>
    %49 = vector.broadcast %8 : vector<1x128xf32> to vector<8x128xf32>
    %50 = arith.mulf %48, %49 : vector<8x128xf32>
    %cst_24 = arith.constant dense<0.000000e+00> : vector<8xf32>
    %51 = vector.multi_reduction <add>, %50, %cst_24 [1] : vector<8x128xf32> to vector<8xf32>
    %52 = vector.shape_cast %51 : vector<8xf32> to vector<8x1xf32>
    %53 = arith.addf %27, %25 : vector<8x128xf32>
    %54 = arith.subf %53, %31 : vector<8x128xf32>
    %cst_25 = arith.constant -1.000000e+30 : f32
    %55 = vector.shape_cast %11 : vector<1x128xi1> to vector<1x128xi1>
    %56 = vector.broadcast %55 : vector<1x128xi1> to vector<8x128xi1>
    %57 = vector.broadcast %cst_25 : f32 to vector<8x128xf32>
    %58 = arith.select %56, %54, %57 : vector<8x128xi1>, vector<8x128xf32>
    %cst_26 = arith.constant dense<0xFF800000> : vector<8xf32>
    %59 = vector.multi_reduction <maximumf>, %58, %cst_26 [1] : vector<8x128xf32> to vector<8xf32>
    %60 = vector.shape_cast %59 : vector<8xf32> to vector<8x1xf32>
    %61 = vector.broadcast %60 : vector<8x1xf32> to vector<8x128xf32>
    %62 = arith.subf %58, %61 : vector<8x128xf32>
    %63 = math.exp %62 : vector<8x128xf32>
    %cst_27 = arith.constant dense<0.000000e+00> : vector<8xf32>
    %64 = vector.multi_reduction <add>, %63, %cst_27 [1] : vector<8x128xf32> to vector<8xf32>
    %65 = vector.shape_cast %64 : vector<8xf32> to vector<8x1xf32>
    %66 = vector.broadcast %65 : vector<8x1xf32> to vector<8x128xf32>
    %67 = arith.divf %63, %66 : vector<8x128xf32>
    %cst_28 = arith.constant 1.000000e-03 : f32
    %68 = vector.broadcast %cst_28 : f32 to vector<8x128xf32>
    %69 = arith.maximumf %67, %68 : vector<8x128xf32>
    %70 = vector.broadcast %8 : vector<1x128xf32> to vector<8x128xf32>
    %71 = arith.mulf %69, %70 : vector<8x128xf32>
    %cst_29 = arith.constant dense<0.000000e+00> : vector<8xf32>
    %72 = vector.multi_reduction <add>, %71, %cst_29 [1] : vector<8x128xf32> to vector<8xf32>
    %73 = vector.shape_cast %72 : vector<8xf32> to vector<8x1xf32>
    %74 = arith.addf %27, %26 : vector<8x128xf32>
    %75 = arith.subf %74, %31 : vector<8x128xf32>
    %cst_30 = arith.constant -1.000000e+30 : f32
    %76 = vector.shape_cast %11 : vector<1x128xi1> to vector<1x128xi1>
    %77 = vector.broadcast %76 : vector<1x128xi1> to vector<8x128xi1>
    %78 = vector.broadcast %cst_30 : f32 to vector<8x128xf32>
    %79 = arith.select %77, %75, %78 : vector<8x128xi1>, vector<8x128xf32>
    %cst_31 = arith.constant dense<0xFF800000> : vector<8xf32>
    %80 = vector.multi_reduction <maximumf>, %79, %cst_31 [1] : vector<8x128xf32> to vector<8xf32>
    %81 = vector.shape_cast %80 : vector<8xf32> to vector<8x1xf32>
    %82 = vector.broadcast %81 : vector<8x1xf32> to vector<8x128xf32>
    %83 = arith.subf %79, %82 : vector<8x128xf32>
    %84 = math.exp %83 : vector<8x128xf32>
    %cst_32 = arith.constant dense<0.000000e+00> : vector<8xf32>
    %85 = vector.multi_reduction <add>, %84, %cst_32 [1] : vector<8x128xf32> to vector<8xf32>
    %86 = vector.shape_cast %85 : vector<8xf32> to vector<8x1xf32>
    %87 = vector.broadcast %86 : vector<8x1xf32> to vector<8x128xf32>
    %88 = arith.divf %84, %87 : vector<8x128xf32>
    %cst_33 = arith.constant 1.000000e-03 : f32
    %89 = vector.broadcast %cst_33 : f32 to vector<8x128xf32>
    %90 = arith.maximumf %88, %89 : vector<8x128xf32>
    %91 = vector.broadcast %8 : vector<1x128xf32> to vector<8x128xf32>
    %92 = arith.mulf %90, %91 : vector<8x128xf32>
    %cst_34 = arith.constant dense<0.000000e+00> : vector<8xf32>
    %93 = vector.multi_reduction <add>, %92, %cst_34 [1] : vector<8x128xf32> to vector<8xf32>
    %94 = vector.shape_cast %93 : vector<8xf32> to vector<8x1xf32>
    %cst_35 = arith.constant 0.000000e+00 : f32
    %95 = vector.broadcast %cst_35 : f32 to vector<8x125xf32>
    %96 = tpu.concatenate %52, %73, %94, %95 in 1 : vector<8x1xf32>, vector<8x1xf32>, vector<8x1xf32>, vector<8x125xf32> -> vector<8x128xf32>
    %c0_36 = arith.constant 0 : index
    %c0_37 = arith.constant 0 : index
    %97 = vector.load %arg12[%c0_36, %c0_37] : memref<8x128xf32, #tpu.memory_space<vmem>>, vector<8x128xf32>
    tpu.vector_store %arg12[%c0_36, %c0_37], %96 {strides = array<i32>} : memref<8x128xf32, #tpu.memory_space<vmem>>, vector<8x128xf32>,
    %c0_38 = arith.constant 0 : index
    %c0_39 = arith.constant 0 : index
    %98 = vector.load %arg8[%c0_38, %c0_39] : memref<32x64xf32, #tpu.memory_space<vmem>>, vector<32x64xf32>
    %cst_40 = arith.constant dense<0.000000e+00> : vector<8x64xf32>
    %99 = tpu.matmul %7, %98, %cst_40 {dimension_numbers = #tpu.dot_dimension_numbers<[1], [0], [0], [1], [0, 0, 1, 1], [], []>} : vector<8x32xf32>, vector<32x64xf32>, vector<8x64xf32> -> vector<8x64xf32>
    %c0_41 = arith.constant 0 : index
    %c0_42 = arith.constant 0 : index
    %100 = vector.load %arg9[%c0_41, %c0_42] : memref<1x64xf32, #tpu.memory_space<vmem>>, vector<1x64xf32>
    %101 = vector.broadcast %100 : vector<1x64xf32> to vector<8x64xf32>
    %102 = arith.addf %99, %101 : vector<8x64xf32>
    %cst_43 = arith.constant 0.000000e+00 : f32
    %103 = vector.broadcast %cst_43 : f32 to vector<8x64xf32>
    %104 = arith.maximumf %102, %103 : vector<8x64xf32>
    %c0_44 = arith.constant 0 : index
    %c0_45 = arith.constant 0 : index
    %105 = vector.load %arg10[%c0_44, %c0_45] : memref<64x640xf32, #tpu.memory_space<vmem>>, vector<64x640xf32>
    %cst_46 = arith.constant dense<0.000000e+00> : vector<8x640xf32>
    %106 = tpu.matmul %104, %105, %cst_46 {dimension_numbers = #tpu.dot_dimension_numbers<[1], [0], [0], [1], [0, 0, 1, 1], [], []>} : vector<8x64xf32>, vector<64x640xf32>, vector<8x640xf32> -> vector<8x640xf32>
    %c0_47 = arith.constant 0 : index
    %c0_48 = arith.constant 0 : index
    %107 = vector.load %arg11[%c0_47, %c0_48] : memref<1x640xf32, #tpu.memory_space<vmem>>, vector<1x640xf32>
    %108 = vector.broadcast %107 : vector<1x640xf32> to vector<8x640xf32>
    %109 = arith.addf %106, %108 : vector<8x640xf32>
    %110 = vector.extract_strided_slice %109 {offsets = [0, 0], sizes = [8, 128], strides = [1, 1]} : vector<8x640xf32> to vector<8x128xf32>
    %111 = vector.extract_strided_slice %109 {offsets = [0, 128], sizes = [8, 128], strides = [1, 1]} : vector<8x640xf32> to vector<8x128xf32>
    %112 = vector.extract_strided_slice %109 {offsets = [0, 256], sizes = [8, 128], strides = [1, 1]} : vector<8x640xf32> to vector<8x128xf32>
    %113 = vector.extract_strided_slice %109 {offsets = [0, 384], sizes = [8, 128], strides = [1, 1]} : vector<8x640xf32> to vector<8x128xf32>
    %114 = vector.extract_strided_slice %109 {offsets = [0, 512], sizes = [8, 128], strides = [1, 1]} : vector<8x640xf32> to vector<8x128xf32>
    %115 = arith.addf %110, %111 : vector<8x128xf32>
    %116 = arith.addf %115, %112 : vector<8x128xf32>
    %117 = arith.addf %116, %113 : vector<8x128xf32>
    %cst_49 = arith.constant 2.500000e-01 : f32
    %118 = vector.broadcast %cst_49 : f32 to vector<8x128xf32>
    %119 = arith.mulf %117, %118 : vector<8x128xf32>
    %120 = arith.addf %114, %110 : vector<8x128xf32>
    %121 = arith.subf %120, %119 : vector<8x128xf32>
    %cst_50 = arith.constant -1.000000e+30 : f32
    %122 = vector.shape_cast %11 : vector<1x128xi1> to vector<1x128xi1>
    %123 = vector.broadcast %122 : vector<1x128xi1> to vector<8x128xi1>
    %124 = vector.broadcast %cst_50 : f32 to vector<8x128xf32>
    %125 = arith.select %123, %121, %124 : vector<8x128xi1>, vector<8x128xf32>
    %cst_51 = arith.constant dense<0xFF800000> : vector<8xf32>
    %126 = vector.multi_reduction <maximumf>, %125, %cst_51 [1] : vector<8x128xf32> to vector<8xf32>
    %127 = vector.shape_cast %126 : vector<8xf32> to vector<8x1xf32>
    %128 = vector.broadcast %127 : vector<8x1xf32> to vector<8x128xf32>
    %129 = arith.subf %125, %128 : vector<8x128xf32>
    %130 = math.exp %129 : vector<8x128xf32>
    %cst_52 = arith.constant dense<0.000000e+00> : vector<8xf32>
    %131 = vector.multi_reduction <add>, %130, %cst_52 [1] : vector<8x128xf32> to vector<8xf32>
    %132 = vector.shape_cast %131 : vector<8xf32> to vector<8x1xf32>
    %133 = vector.broadcast %132 : vector<8x1xf32> to vector<8x128xf32>
    %134 = arith.divf %130, %133 : vector<8x128xf32>
    %cst_53 = arith.constant 1.000000e-03 : f32
    %135 = vector.broadcast %cst_53 : f32 to vector<8x128xf32>
    %136 = arith.maximumf %134, %135 : vector<8x128xf32>
    %137 = vector.broadcast %8 : vector<1x128xf32> to vector<8x128xf32>
    %138 = arith.mulf %136, %137 : vector<8x128xf32>
    %cst_54 = arith.constant dense<0.000000e+00> : vector<8xf32>
    %139 = vector.multi_reduction <add>, %138, %cst_54 [1] : vector<8x128xf32> to vector<8xf32>
    %140 = vector.shape_cast %139 : vector<8xf32> to vector<8x1xf32>
    %141 = arith.addf %114, %111 : vector<8x128xf32>
    %142 = arith.subf %141, %119 : vector<8x128xf32>
    %cst_55 = arith.constant -1.000000e+30 : f32
    %143 = vector.shape_cast %11 : vector<1x128xi1> to vector<1x128xi1>
    %144 = vector.broadcast %143 : vector<1x128xi1> to vector<8x128xi1>
    %145 = vector.broadcast %cst_55 : f32 to vector<8x128xf32>
    %146 = arith.select %144, %142, %145 : vector<8x128xi1>, vector<8x128xf32>
    %cst_56 = arith.constant dense<0xFF800000> : vector<8xf32>
    %147 = vector.multi_reduction <maximumf>, %146, %cst_56 [1] : vector<8x128xf32> to vector<8xf32>
    %148 = vector.shape_cast %147 : vector<8xf32> to vector<8x1xf32>
    %149 = vector.broadcast %148 : vector<8x1xf32> to vector<8x128xf32>
    %150 = arith.subf %146, %149 : vector<8x128xf32>
    %151 = math.exp %150 : vector<8x128xf32>
    %cst_57 = arith.constant dense<0.000000e+00> : vector<8xf32>
    %152 = vector.multi_reduction <add>, %151, %cst_57 [1] : vector<8x128xf32> to vector<8xf32>
    %153 = vector.shape_cast %152 : vector<8xf32> to vector<8x1xf32>
    %154 = vector.broadcast %153 : vector<8x1xf32> to vector<8x128xf32>
    %155 = arith.divf %151, %154 : vector<8x128xf32>
    %cst_58 = arith.constant 1.000000e-03 : f32
    %156 = vector.broadcast %cst_58 : f32 to vector<8x128xf32>
    %157 = arith.maximumf %155, %156 : vector<8x128xf32>
    %158 = vector.broadcast %8 : vector<1x128xf32> to vector<8x128xf32>
    %159 = arith.mulf %157, %158 : vector<8x128xf32>
    %cst_59 = arith.constant dense<0.000000e+00> : vector<8xf32>
    %160 = vector.multi_reduction <add>, %159, %cst_59 [1] : vector<8x128xf32> to vector<8xf32>
    %161 = vector.shape_cast %160 : vector<8xf32> to vector<8x1xf32>
    %162 = arith.addf %114, %112 : vector<8x128xf32>
    %163 = arith.subf %162, %119 : vector<8x128xf32>
    %cst_60 = arith.constant -1.000000e+30 : f32
    %164 = vector.shape_cast %11 : vector<1x128xi1> to vector<1x128xi1>
    %165 = vector.broadcast %164 : vector<1x128xi1> to vector<8x128xi1>
    %166 = vector.broadcast %cst_60 : f32 to vector<8x128xf32>
    %167 = arith.select %165, %163, %166 : vector<8x128xi1>, vector<8x128xf32>
    %cst_61 = arith.constant dense<0xFF800000> : vector<8xf32>
    %168 = vector.multi_reduction <maximumf>, %167, %cst_61 [1] : vector<8x128xf32> to vector<8xf32>
    %169 = vector.shape_cast %168 : vector<8xf32> to vector<8x1xf32>
    %170 = vector.broadcast %169 : vector<8x1xf32> to vector<8x128xf32>
    %171 = arith.subf %167, %170 : vector<8x128xf32>
    %172 = math.exp %171 : vector<8x128xf32>
    %cst_62 = arith.constant dense<0.000000e+00> : vector<8xf32>
    %173 = vector.multi_reduction <add>, %172, %cst_62 [1] : vector<8x128xf32> to vector<8xf32>
    %174 = vector.shape_cast %173 : vector<8xf32> to vector<8x1xf32>
    %175 = vector.broadcast %174 : vector<8x1xf32> to vector<8x128xf32>
    %176 = arith.divf %172, %175 : vector<8x128xf32>
    %cst_63 = arith.constant 1.000000e-03 : f32
    %177 = vector.broadcast %cst_63 : f32 to vector<8x128xf32>
    %178 = arith.maximumf %176, %177 : vector<8x128xf32>
    %179 = vector.broadcast %8 : vector<1x128xf32> to vector<8x128xf32>
    %180 = arith.mulf %178, %179 : vector<8x128xf32>
    %cst_64 = arith.constant dense<0.000000e+00> : vector<8xf32>
    %181 = vector.multi_reduction <add>, %180, %cst_64 [1] : vector<8x128xf32> to vector<8xf32>
    %182 = vector.shape_cast %181 : vector<8xf32> to vector<8x1xf32>
    %183 = arith.addf %114, %113 : vector<8x128xf32>
    %184 = arith.subf %183, %119 : vector<8x128xf32>
    %cst_65 = arith.constant -1.000000e+30 : f32
    %185 = vector.shape_cast %11 : vector<1x128xi1> to vector<1x128xi1>
    %186 = vector.broadcast %185 : vector<1x128xi1> to vector<8x128xi1>
    %187 = vector.broadcast %cst_65 : f32 to vector<8x128xf32>
    %188 = arith.select %186, %184, %187 : vector<8x128xi1>, vector<8x128xf32>
    %cst_66 = arith.constant dense<0xFF800000> : vector<8xf32>
    %189 = vector.multi_reduction <maximumf>, %188, %cst_66 [1] : vector<8x128xf32> to vector<8xf32>
    %190 = vector.shape_cast %189 : vector<8xf32> to vector<8x1xf32>
    %191 = vector.broadcast %190 : vector<8x1xf32> to vector<8x128xf32>
    %192 = arith.subf %188, %191 : vector<8x128xf32>
    %193 = math.exp %192 : vector<8x128xf32>
    %cst_67 = arith.constant dense<0.000000e+00> : vector<8xf32>
    %194 = vector.multi_reduction <add>, %193, %cst_67 [1] : vector<8x128xf32> to vector<8xf32>
    %195 = vector.shape_cast %194 : vector<8xf32> to vector<8x1xf32>
    %196 = vector.broadcast %195 : vector<8x1xf32> to vector<8x128xf32>
    %197 = arith.divf %193, %196 : vector<8x128xf32>
    %cst_68 = arith.constant 1.000000e-03 : f32
    %198 = vector.broadcast %cst_68 : f32 to vector<8x128xf32>
    %199 = arith.maximumf %197, %198 : vector<8x128xf32>
    %200 = vector.broadcast %8 : vector<1x128xf32> to vector<8x128xf32>
    %201 = arith.mulf %199, %200 : vector<8x128xf32>
    %cst_69 = arith.constant dense<0.000000e+00> : vector<8xf32>
    %202 = vector.multi_reduction <add>, %201, %cst_69 [1] : vector<8x128xf32> to vector<8xf32>
    %203 = vector.shape_cast %202 : vector<8xf32> to vector<8x1xf32>
    %cst_70 = arith.constant 0.000000e+00 : f32
    %204 = vector.broadcast %cst_70 : f32 to vector<8x124xf32>
    %205 = tpu.concatenate %140, %161, %182, %203, %204 in 1 : vector<8x1xf32>, vector<8x1xf32>, vector<8x1xf32>, vector<8x1xf32>, vector<8x124xf32> -> vector<8x128xf32>
    %c0_71 = arith.constant 0 : index
    %c0_72 = arith.constant 0 : index
    %206 = vector.load %arg13[%c0_71, %c0_72] : memref<8x128xf32, #tpu.memory_space<vmem>>, vector<8x128xf32>
    tpu.vector_store %arg13[%c0_71, %c0_72], %205 {strides = array<i32>} : memref<8x128xf32, #tpu.memory_space<vmem>>, vector<8x128xf32>,
    return
  }
}

</mosaic_0001>

<bundles_post_ra>
// kernel: tpu_custom_call.1
= control target key start
LH: loop header
LB: loop body
LE: loop exit
PB: predicated region body
PF: predicated region fallthrough
CT: control target
= control target key end

     0   :  { %19 = vsyncpa [#allocation3], 0  ;;  %s1429_s0 = inlined_call_operand.hbm [shape: f32[8,16], index: 0, kind: input, shape index: {}]   ;;  %s1430_s1 = inlined_call_operand.hbm [shape: f32[16,32], index: 1, kind: input, shape index: {}]   ;;  %s1431_s2 = inlined_call_operand.hbm [shape: f32[1,32], index: 2, kind: input, shape index: {}]   ;;  %s1432_s3 = inlined_call_operand.hbm [shape: f32[1,128], index: 3, kind: input, shape index: {}]   ;;  %s1433_s4 = inlined_call_operand.hbm [shape: f32[32,64], index: 4, kind: input, shape index: {}]   ;;  %s1434_s5 = inlined_call_operand.hbm [shape: f32[1,64], index: 5, kind: input, shape index: {}]   ;;  %s1435_s6 = inlined_call_operand.hbm [shape: f32[64,512], index: 6, kind: input, shape index: {}]   ;;  %s1436_s7 = inlined_call_operand.vmem [shape: f32[1,512], index: 7, kind: input, shape index: {}]   ;;  %s1437_s8 = inlined_call_operand.hbm [shape: f32[32,64], index: 8, kind: input, shape index: {}]   ;;  %s1438_s9 = inlined_call_operand.hbm [shape: f32[1,64], index: 9, kind: input, shape index: {}]   ;;  %s1439_s10 = inlined_call_operand.hbm [shape: f32[64,640], index: 10, kind: input, shape index: {}]   ;;  %s1440_s11 = inlined_call_operand.vmem [shape: f32[1,640], index: 11, kind: input, shape index: {}]   ;;  %s1441_s12 = inlined_call_operand.hbm [shape: f32[8,128], index: 12, kind: output, shape index: {0}]   ;;  %s1442_s13 = inlined_call_operand.hbm [shape: f32[8,128], index: 13, kind: output, shape index: {1}]  }
   0x1   :  { %20 = vsyncpa [#allocation6], 0 }
   0x2   :  { %21 = vsyncpa [#allocation9], 0 }
   0x3   :  { %22 = vsyncpa [#allocation12], 0 }
   0x4   :  { %23 = vsyncpa [#allocation15], 0 }
   0x5   :  { %24 = vsyncpa [#allocation18], 0 }
   0x6   :  { %25 = vsyncpa [#allocation4], 0  ;;  %s42_s27 = sshll.u32 %s1430_s1, 4  ;;  %s43_s27 = int_to_ptr.hbm [resolvable:$true] %s42_s27 }
   0x7   :  { %26 = vsyncpa [#allocation21], 0  ;;  %s1202_s28 = smov [#allocation5]   ;;  %s67_s15 = sshll.u32 %s1432_s3, 4  ;;  %s68_s15 = int_to_ptr.hbm [resolvable:$true] %s67_s15 }
   0x8   :  { %s44_s29 = sshll.u32 %s1202_s28, 4  ;;  %s1203_s16 = smov 128   ;;  %s45_s29 = int_to_ptr.vmem [resolvable:$true] %s44_s29 }
   0x9   :  { %s1204_s17 = smov 8   ;;  %s1205_s18 = smov [#allocation8]  }
   0xa   :  { %50 = dma.hbm_to_vmem [thread:$0]  %s43_s27, 256, %s45_s29, [#allocation6], %s1203_s16, %s1203_s16, %s1204_s17  }
   0xb   :  { %s69_s19 = sshll.u32 %s1205_s18, 4  ;;  %s91_s21 = sshll.u32 %s1434_s5, 4  ;;  %s70_s19 = int_to_ptr.vmem [resolvable:$true] %s69_s19  ;;  %s92_s21 = int_to_ptr.hbm [resolvable:$true] %s91_s21 }
   0xc   :  { %72 = dma.hbm_to_vmem [thread:$0]  %s68_s15, 16, %s70_s19, [#allocation9]  }
   0xd   :  { %s116_s3 = sshll.u32 %s1437_s8, 4  ;;  %s1206_s24 = smov [#allocation11]   ;;  %s117_s3 = int_to_ptr.hbm [resolvable:$true] %s116_s3 }
   0xe   :  { %s93_s25 = sshll.u32 %s1206_s24, 4  ;;  %s1207_s26 = smov [#allocation14]   ;;  %s94_s25 = int_to_ptr.vmem [resolvable:$true] %s93_s25 }
   0xf   :  { %96 = dma.hbm_to_vmem [thread:$0]  %s92_s21, 16, %s94_s25, [#allocation12]  }
  0x10   :  { %s118_s27 = sshll.u32 %s1207_s26, 4  ;;  %s32_s30 = sshll.u32 %s1429_s0, 4  ;;  %s119_s27 = int_to_ptr.vmem [resolvable:$true] %s118_s27  ;;  %s33_s30 = int_to_ptr.hbm [resolvable:$true] %s32_s30 }
  0x11   :  { %124 = dma.hbm_to_vmem [thread:$0]  %s117_s3, 512, %s119_s27, [#allocation15], %s1203_s16, %s1203_s16, %s1204_s17  }
  0x12   :  { %s56_s8 = sshll.u32 %s1431_s2, 4  ;;  %s1208_s15 = smov [#allocation2]   ;;  %s57_s8 = int_to_ptr.hbm [resolvable:$true] %s56_s8 }
  0x13   :  { %s34_s18 = sshll.u32 %s1208_s15, 4  ;;  %s1209_s19 = smov [#allocation7]   ;;  %s35_s18 = int_to_ptr.vmem [resolvable:$true] %s34_s18 }
  0x14   :  { %37 = dma.hbm_to_vmem [thread:$0]  %s33_s30, 128, %s35_s18, [#allocation3]  }
  0x15   :  { %s58_s20 = sshll.u32 %s1209_s19, 4  ;;  %s77_s0 = sshll.u32 %s1433_s4, 4  ;;  %s59_s20 = int_to_ptr.vmem [resolvable:$true] %s58_s20  ;;  %s78_s0 = int_to_ptr.hbm [resolvable:$true] %s77_s0 }
  0x16   :  { %61 = dma.hbm_to_vmem [thread:$0]  %s57_s8, 16, %s59_s20, [#allocation6]  }
  0x17   :  { %s101_s3 = sshll.u32 %s1435_s6, 4  ;;  %s1210_s24 = smov [#allocation10]   ;;  %s102_s3 = int_to_ptr.hbm [resolvable:$true] %s101_s3 }
  0x18   :  { %s79_s2 = sshll.u32 %s1210_s24, 4  ;;  %s1211_s25 = smov [#allocation13]   ;;  %s80_s2 = int_to_ptr.vmem [resolvable:$true] %s79_s2 }
  0x19   :  { %85 = dma.hbm_to_vmem [thread:$0]  %s78_s0, 512, %s80_s2, [#allocation9], %s1203_s16, %s1203_s16, %s1204_s17  }
  0x1a   :  { %s103_s26 = sshll.u32 %s1211_s25, 4  ;;  %s1212_s27 = smov 512   ;;  %s104_s26 = int_to_ptr.vmem [resolvable:$true] %s103_s26 }
  0x1b   :  { %s1213_s4 = smov 32   ;;  %s130_s30 = sshll.u32 %s1438_s9, 4  ;;  %s131_s30 = int_to_ptr.hbm [resolvable:$true] %s130_s30 }
  0x1c   :  { %109 = dma.hbm_to_vmem [thread:$0]  %s102_s3, 4096, %s104_s26, [#allocation12], %s1212_s27, %s1212_s27, %s1213_s4  }
  0x1d   :  { %s1214_s6 = smov [#allocation16]   ;;  %s140_s15 = sshll.u32 %s1439_s10, 4  ;;  %s141_s15 = int_to_ptr.hbm [resolvable:$true] %s140_s15 }
  0x1e   :  { %s132_s5 = sshll.u32 %s1214_s6, 4  ;;  %s1215_s16 = smov [#allocation17]   ;;  %s133_s5 = int_to_ptr.vmem [resolvable:$true] %s132_s5 }
  0x1f   :  { %135 = dma.hbm_to_vmem [thread:$0]  %s131_s30, 16, %s133_s5, [#allocation15]  }
  0x20   :  { %s142_s17 = sshll.u32 %s1215_s16, 4  ;;  %s1216_s18 = smov 640   ;;  %s143_s17 = int_to_ptr.vmem [resolvable:$true] %s142_s17 }
  0x21   :  { %s1217_s19 = smov 40  }
  0x22   :  { %148 = dma.hbm_to_vmem [thread:$0]  %s141_s15, 5120, %s143_s17, [#allocation18], %s1216_s18, %s1216_s18, %s1217_s19  }
  0x23   :  { %1186 = dma.done.wait [#allocation3], 128  }
  0x24   :  { %1187 = vsyncadd [#allocation3], 4294967168 }
  0x25   :  { %1188 = dma.done.wait [#allocation6], 272  }
  0x26   :  { %1189 = vsyncadd [#allocation6], 4294967024 }
  0x27   :  { %1190 = dma.done.wait [#allocation9], 528  }
  0x28   :  { %1191 = vsyncadd [#allocation9], 4294966768 }
  0x29   :  { %1192 = dma.done.wait [#allocation12], 4112  }
  0x2a   :  { %1193 = vsyncadd [#allocation12], 4294963184 }
  0x2b   :  { %1194 = dma.done.wait [#allocation15], 528  }
  0x2c   :  { %1195 = vsyncadd [#allocation15], 4294966768 }
  0x2d   :  { %1196 = dma.done.wait [#allocation18], 5120  }
  0x2e   :  { %1197 = vsyncadd [#allocation18], 4294962176  ;;  %v193_v0 = vld [vmem:[#allocation5 + $0x8] sm:$0xff]  ;;  %v192_v1 = vld [vmem:[#allocation5] sm:$0xff]  ;;  %vm198_vm0 = vcmask 130048   ;;  %vm235_vm1 = vcmask 261120  }
  0x2f   :  { %216 = vmatpush.msra.mxu0 %v193_v0  ;;  %v191_v2 = vld [vmem:[#allocation2] sm:$0xff]  ;;  %v230_v3 = vld [vmem:[#allocation10 + $0x18] sm:$0xff]  ;;  %v229_v4 = vld [vmem:[#allocation10 + $0x10] sm:$0xff]  ;;  %vm302_vm2 = vcmask 523264   ;;  %s805_s22 = sshll.u32 %s1441_s12, 4  ;;  %s1219_s23 = smov [#allocation20]   ;;  %s806_s22 = int_to_ptr.hbm [resolvable:$true] %s805_s22 }
  0x30   :  { %251 = vmatpush.msra.mxu1 %v230_v3  ;;  %v228_v5 = vld [vmem:[#allocation10 + $0x8] sm:$0xff]  ;;  %v227_v6 = vld [vmem:[#allocation10] sm:$0xff]  ;;  %v290_v9 = vld [vmem:[#allocation13 + $0xf0] sm:$0xff]  ;;  %s814_s3 = sshll.u32 %s1219_s23, 4  ;;  %s816_s12 = sshll.u32 %s1442_s13, 4  ;;  %s815_s3 = int_to_ptr.vmem [resolvable:$true] %s814_s3  ;;  %s817_s12 = int_to_ptr.hbm [resolvable:$true] %s816_s12 }
  0x31   :  { %217 = vmatpush.msra.mxu0 %v192_v1  ;;  %v288_v7 = vld [vmem:[#allocation13 + $0xe0] sm:$0xff]  ;;  %v289_v8 = vld [vmem:[#allocation13 + $0xe8] sm:$0xff]  ;;  %v291_v10 = vld [vmem:[#allocation13 + $0xf8] sm:$0xff] }
  0x32   :  { %836 = vmatmul.msk.f32.vlgmr.msra.gmra.mxu0 %vm198_vm0, %v191_v2  ;;  %252 = vmatpush.msra.mxu1 %v229_v4  ;;  %v284_v11 = vld [vmem:[#allocation13 + $0xc0] sm:$0xff]  ;;  %v285_v12 = vld [vmem:[#allocation13 + $0xc8] sm:$0xff]  ;;  %v286_v13 = vld [vmem:[#allocation13 + $0xd0] sm:$0xff] }
  0x33   :  { %314 = vmatpush.msra.mxu2 %v288_v7  ;;  %334 = vmatpush.msra.mxu3 %v289_v8  ;;  %v287_v14 = vld [vmem:[#allocation13 + $0xd8] sm:$0xff]  ;;  %v280_v15 = vld [vmem:[#allocation13 + $0xa0] sm:$0xff]  ;;  %v281_v16 = vld [vmem:[#allocation13 + $0xa8] sm:$0xff] }
  0x34   :  { %253 = vmatpush.msra.mxu1 %v228_v5  ;;  %354 = vmatpush.msrb.mxu0 %v290_v9  ;;  %v282_v17 = vld [vmem:[#allocation13 + $0xb0] sm:$0xff]  ;;  %v283_v18 = vld [vmem:[#allocation13 + $0xb8] sm:$0xff]  ;;  %v276_v19 = vld [vmem:[#allocation13 + $0x80] sm:$0xff] }
  0x35   :  { %315 = vmatpush.msra.mxu2 %v284_v11  ;;  %335 = vmatpush.msra.mxu3 %v285_v12  ;;  %v277_v20 = vld [vmem:[#allocation13 + $0x88] sm:$0xff]  ;;  %v278_v21 = vld [vmem:[#allocation13 + $0x90] sm:$0xff]  ;;  %v279_v22 = vld [vmem:[#allocation13 + $0x98] sm:$0xff] }
  0x36   :  { %254 = vmatpush.msra.mxu1 %v227_v6  ;;  %355 = vmatpush.msrb.mxu0 %v286_v13  ;;  %v272_v23 = vld [vmem:[#allocation13 + $0x60] sm:$0xff]  ;;  %v273_v24 = vld [vmem:[#allocation13 + $0x68] sm:$0xff]  ;;  %v274_v25 = vld [vmem:[#allocation13 + $0x70] sm:$0xff] }
  0x37   :  { %316 = vmatpush.msra.mxu2 %v280_v15  ;;  %336 = vmatpush.msra.mxu3 %v281_v16  ;;  %v275_v26 = vld [vmem:[#allocation13 + $0x78] sm:$0xff]  ;;  %v268_v31 = vld [vmem:[#allocation13 + $0x40] sm:$0xff]  ;;  %v269_v32 = vld [vmem:[#allocation13 + $0x48] sm:$0xff] }
  0x38   :  { %374 = vmatpush.msrb.mxu1 %v291_v10  ;;  %356 = vmatpush.msrb.mxu0 %v282_v17  ;;  %v866_v27 = vld [vmem:[#allocation7] ss:$0 sm:$0xff]  ;;  %v270_v33 = vld [vmem:[#allocation13 + $0x50] sm:$0xff]  ;;  %v264_v35 = vld [vmem:[#allocation13 + $0x20] sm:$0xff] }
  0x39   :  { %317 = vmatpush.msra.mxu2 %v276_v19  ;;  %337 = vmatpush.msra.mxu3 %v277_v20  ;;  %v271_v34 = vld [vmem:[#allocation13 + $0x58] sm:$0xff]  ;;  %v265_v36 = vld [vmem:[#allocation13 + $0x28] sm:$0xff]  ;;  %v266_v37 = vld [vmem:[#allocation13 + $0x30] sm:$0xff] }
  0x3a   :  { %375 = vmatpush.msrb.mxu1 %v287_v14  ;;  %357 = vmatpush.msrb.mxu0 %v278_v21  ;;  %v267_v38 = vld [vmem:[#allocation13 + $0x38] sm:$0xff]  ;;  %v260_v39 = vld [vmem:[#allocation13] sm:$0xff]  ;;  %v261_v40 = vld [vmem:[#allocation13 + $0x8] sm:$0xff] }
  0x3b   :  { %318 = vmatpush.msra.mxu2 %v272_v23  ;;  %338 = vmatpush.msra.mxu3 %v273_v24  ;;  %v262_v41 = vld [vmem:[#allocation13 + $0x10] sm:$0xff]  ;;  %v263_v42 = vld [vmem:[#allocation13 + $0x18] sm:$0xff]  ;;  %v489_v45 = vld [vmem:[#allocation14 + $0x8] sm:$0xff] }
  0x3c   :  { %376 = vmatpush.msrb.mxu1 %v283_v18  ;;  %358 = vmatpush.msrb.mxu0 %v274_v25  ;;  %v491_v43 = vld [vmem:[#allocation14 + $0x18] sm:$0xff]  ;;  %v490_v44 = vld [vmem:[#allocation14 + $0x10] sm:$0xff]  ;;  %v488_v46 = vld [vmem:[#allocation14] sm:$0xff] }
  0x3d   :  { %319 = vmatpush.msra.mxu2 %v268_v31  ;;  %339 = vmatpush.msra.mxu3 %v269_v32  ;;  %v552_v47 = vld [vmem:[#allocation17 + $0x118] sm:$0xff]  ;;  %v547_v48 = vld [vmem:[#allocation17 + $0xf0] sm:$0xff]  ;;  %v542_v53 = vld [vmem:[#allocation17 + $0xc8] sm:$0xff] }
  0x3e   :  { %377 = vmatpush.msrb.mxu1 %v279_v22  ;;  %359 = vmatpush.msrb.mxu0 %v270_v33  ;;  %v867_v49 = vld [vmem:[#allocation11] ss:$0 sm:$0xff]  ;;  %v537_v54 = vld [vmem:[#allocation17 + $0xa0] sm:$0xff]  ;;  %v554_v56 = vld [vmem:[#allocation17 + $0x128] sm:$0xff] }
  0x3f   :  { %320 = vmatpush.msra.mxu2 %v264_v35  ;;  %340 = vmatpush.msra.mxu3 %v265_v36  ;;  %v553_v55 = vld [vmem:[#allocation17 + $0x120] sm:$0xff]  ;;  %v555_v57 = vld [vmem:[#allocation17 + $0x130] sm:$0xff]  ;;  %v532_v58 = vld [vmem:[#allocation17 + $0x78] sm:$0xff] }
  0x40   :  { %378 = vmatpush.msrb.mxu1 %v275_v26  ;;  %360 = vmatpush.msrb.mxu0 %v266_v37  ;;  %v548_v59 = vld [vmem:[#allocation17 + $0xf8] sm:$0xff]  ;;  %v549_v60 = vld [vmem:[#allocation17 + $0x100] sm:$0xff]  ;;  %v550_v61 = vld [vmem:[#allocation17 + $0x108] sm:$0xff] }
  0x41   :  { %321 = vmatpush.msra.mxu2 %v260_v39  ;;  %341 = vmatpush.msra.mxu3 %v261_v40  ;;  %v527_v62 = vld [vmem:[#allocation17 + $0x50] sm:$0xff]  ;;  %v544_v0 = vld [vmem:[#allocation17 + $0xd8] sm:$0xff]  ;;  %v545_v1 = vld [vmem:[#allocation17 + $0xe0] sm:$0xff]  ;;  %v224_v39 = vlaneseq }
  0x42   :  { %379 = vmatpush.msrb.mxu1 %v271_v34  ;;  %361 = vmatpush.msrb.mxu0 %v262_v41  ;;  %v543_v63 = vld [vmem:[#allocation17 + $0xd0] sm:$0xff]  ;;  %v522_v2 = vld [vmem:[#allocation17 + $0x28] sm:$0xff]  ;;  %v540_v5 = vld [vmem:[#allocation17 + $0xb8] sm:$0xff] }
  0x43   :  { %508 = vmatpush.msrb.mxu2 %v491_v43  ;;  %580 = vmatpush.msrb.mxu3 %v552_v47  ;;  %v538_v3 = vld [vmem:[#allocation17 + $0xa8] sm:$0xff]  ;;  %v539_v4 = vld [vmem:[#allocation17 + $0xb0] sm:$0xff]  ;;  %v517_v6 = vld [vmem:[#allocation17] sm:$0xff]  ;;  %v1340_v43 = vand.u32 127, %v224_v39 }
  0x44   :  { %380 = vmatpush.msrb.mxu1 %v267_v38  ;;  %600 = vmatpush.msra.mxu0 %v553_v55  ;;  %v533_v7 = vld [vmem:[#allocation17 + $0x80] sm:$0xff]  ;;  %v534_v8 = vld [vmem:[#allocation17 + $0x88] sm:$0xff]  ;;  %v535_v9 = vld [vmem:[#allocation17 + $0x90] sm:$0xff] }
  0x45   :  { %509 = vmatpush.msrb.mxu2 %v490_v44  ;;  %581 = vmatpush.msrb.mxu3 %v547_v48  ;;  %v556_v10 = vld [vmem:[#allocation17 + $0x138] sm:$0xff]  ;;  %v529_v12 = vld [vmem:[#allocation17 + $0x60] sm:$0xff]  ;;  %v530_v13 = vld [vmem:[#allocation17 + $0x68] sm:$0xff]  ;;  %vm226_vm3 = vcmp.lt.s32.totalorder %v1340_v43, 51 }
  0x46   :  { %381 = vmatpush.msrb.mxu1 %v263_v42  ;;  %601 = vmatpush.msra.mxu0 %v548_v59  ;;  %v528_v11 = vld [vmem:[#allocation17 + $0x58] sm:$0xff]  ;;  %v551_v14 = vld [vmem:[#allocation17 + $0x110] sm:$0xff]  ;;  %v525_v17 = vld [vmem:[#allocation17 + $0x40] sm:$0xff] }
  0x47   :  { %510 = vmatpush.msrb.mxu2 %v489_v45  ;;  %582 = vmatpush.msrb.mxu3 %v542_v53  ;;  %v523_v15 = vld [vmem:[#allocation17 + $0x30] sm:$0xff]  ;;  %v524_v16 = vld [vmem:[#allocation17 + $0x38] sm:$0xff]  ;;  %v546_v18 = vld [vmem:[#allocation17 + $0xe8] sm:$0xff] }
  0x48   :  { %602 = vmatpush.msra.mxu0 %v543_v63  ;;  %v518_v19 = vld [vmem:[#allocation17 + $0x8] sm:$0xff]  ;;  %v519_v20 = vld [vmem:[#allocation17 + $0x10] sm:$0xff]  ;;  %v520_v21 = vld [vmem:[#allocation17 + $0x18] sm:$0xff] }
  0x49   :  { %511 = vmatpush.msrb.mxu2 %v488_v46  ;;  %583 = vmatpush.msrb.mxu3 %v537_v54  ;;  %v541_v22 = vld [vmem:[#allocation17 + $0xc0] sm:$0xff]  ;;  %v536_v23 = vld [vmem:[#allocation17 + $0x98] sm:$0xff]  ;;  %v531_v24 = vld [vmem:[#allocation17 + $0x70] sm:$0xff] }
  0x4a   :  { %603 = vmatpush.msra.mxu0 %v538_v3  ;;  %v526_v25 = vld [vmem:[#allocation17 + $0x48] sm:$0xff]  ;;  %v521_v26 = vld [vmem:[#allocation17 + $0x20] sm:$0xff]  ;;  %v868_v45 = vld [vmem:[#allocation16] ss:$0 sm:$0xff] }
  0x4b   :  { %584 = vmatpush.msrb.mxu3 %v532_v58 }
  0x4c   :  { %604 = vmatpush.msra.mxu0 %v533_v7 }
  0x4d   :  { %585 = vmatpush.msrb.mxu3 %v527_v62 }
  0x4e   :  { %605 = vmatpush.msra.mxu0 %v528_v11 }
  0x4f   :  { %586 = vmatpush.msrb.mxu3 %v522_v2 }
  0x50   :  { %606 = vmatpush.msra.mxu0 %v523_v15 }
  0x51   :  { %587 = vmatpush.msrb.mxu3 %v517_v6 }
  0x52   :  { %607 = vmatpush.msra.mxu0 %v518_v19 }
  0xaf   :  { %v219_v28 = vpop.f32.mrf.mxu0 }
  0xb0   :  { %v220_v29 = vadd.f32 %v866_v27, %v219_v28  ;;  %v292_v27 = vld [vmem:[%s1436_s7] sm:$0xf] }
  0xb1   :  { %v296_v28 = vperm.slane %v292_v27, 2  ;;  %v294_v34 = vperm.slane %v292_v27, 0  ;;  %v295_v35 = vperm.slane %v292_v27, 1 }
  0xb2   :  { %v222_v30 = vmax.f32 %v220_v29, 0.0  ;;  %v297_v29 = vperm.slane %v292_v27, 3 }
  0xb4   :  { %837 = vmatmul.msk.f32.vlgmr.msra.gmra.mxu1 %vm235_vm1, %v222_v30 }
  0xb5   :  { %620 = vmatpush.msra.mxu1 %v554_v56 }
  0xb7   :  { %621 = vmatpush.msra.mxu1 %v549_v60 }
  0xb9   :  { %622 = vmatpush.msra.mxu1 %v544_v0 }
  0xbb   :  { %623 = vmatpush.msra.mxu1 %v539_v4 }
  0xbd   :  { %624 = vmatpush.msra.mxu1 %v534_v8 }
  0xbf   :  { %625 = vmatpush.msra.mxu1 %v529_v12 }
  0xc1   :  { %626 = vmatpush.msra.mxu1 %v524_v16 }
  0xc3   :  { %627 = vmatpush.msra.mxu1 %v519_v20 }
 0x131   :  { %v256_v50 = vpop.f32.mrf.mxu1 }
 0x132   :  { %v257_v51 = vadd.f32 %v867_v49, %v256_v50 }
 0x134   :  { %v259_v52 = vmax.f32 %v257_v51, 0.0 }
 0x136   :  { %838 = vmatmul.msk.f32.vlgmr.msra.gmra.mxu2 %vm302_vm2, %v259_v52  ;;  %839 = vmatmul.msk.f32.vlgmr.msra.gmra.mxu3 %vm302_vm2, %v259_v52 }
 0x137   :  { %840 = vmatmul.msk.f32.vlgmr.msrb.gmra.mxu0 %vm302_vm2, %v259_v52  ;;  %841 = vmatmul.msk.f32.vlgmr.msrb.gmra.mxu1 %vm302_vm2, %v259_v52 }
 0x138   :  { %640 = vmatpush.msra.mxu2 %v555_v57  ;;  %660 = vmatpush.msra.mxu3 %v556_v10 }
 0x13a   :  { %641 = vmatpush.msra.mxu2 %v550_v61  ;;  %661 = vmatpush.msra.mxu3 %v551_v14  ;;  %v557_v61 = vld [vmem:[%s1440_s11] sm:$0x1f]  ;;  %s1218_s11 = smov [#allocation19]  }
 0x13b   :  { %v560_v62 = vperm.slane %v557_v61, 1  ;;  %v559_v63 = vperm.slane %v557_v61, 0  ;;  %v562_v6 = vperm.slane %v557_v61, 3  ;;  %s803_s1 = sshll.u32 %s1218_s11, 4  ;;  %s804_s1 = int_to_ptr.vmem [resolvable:$true] %s803_s1 }
 0x13c   :  { %642 = vmatpush.msra.mxu2 %v545_v1  ;;  %662 = vmatpush.msra.mxu3 %v546_v18  ;;  %v561_v1 = vperm.slane %v557_v61, 2 }
 0x13e   :  { %842 = vmatmul.msk.f32.vlgmr.msrb.gmra.mxu2 %vm235_vm1, %v222_v30  ;;  %663 = vmatpush.msra.mxu3 %v541_v22 }
 0x13f   :  { %643 = vmatpush.msra.mxu2 %v540_v5 }
 0x140   :  { %664 = vmatpush.msra.mxu3 %v536_v23 }
 0x141   :  { %644 = vmatpush.msra.mxu2 %v535_v9 }
 0x142   :  { %665 = vmatpush.msra.mxu3 %v531_v24 }
 0x143   :  { %645 = vmatpush.msra.mxu2 %v530_v13  ;;  %v563_v13 = vperm.slane %v557_v61, 4 }
 0x144   :  { %666 = vmatpush.msra.mxu3 %v526_v25 }
 0x145   :  { %646 = vmatpush.msra.mxu2 %v525_v17 }
 0x146   :  { %667 = vmatpush.msra.mxu3 %v521_v26 }
 0x147   :  { %647 = vmatpush.msra.mxu2 %v520_v21 }
 0x1b4   :  { %v363_v30 = vpop.f32.mrf.mxu0  ;;  %v383_v31 = vpop.f32.mrf.mxu1 }
 0x1b5   :  { %v364_v32 = vadd.f32 %v363_v30, %v296_v28  ;;  %v384_v33 = vadd.f32 %v383_v31, %v297_v29 }
 0x1b7   :  { %v1338_v36 = vadd.f32 %v384_v33, %v364_v32 }
 0x1b9   :  { %v323_v37 = vpop.f32.mrf.mxu2  ;;  %v343_v38 = vpop.f32.mrf.mxu3 }
 0x1ba   :  { %v324_v40 = vadd.f32 %v323_v37, %v294_v34  ;;  %v344_v41 = vadd.f32 %v343_v38, %v295_v35 }
 0x1bc   :  { %v386_v42 = vadd.f32 %v344_v41, %v324_v40  ;;  %v389_v46 = vadd.f32 %v384_v33, %v324_v40  ;;  %v423_v54 = vadd.f32 %v384_v33, %v344_v41 }
 0x1be   :  { %v387_v44 = vadd.f32 %v386_v42, %v364_v32 }
 0x1c0   :  { %v388_v47 = vmul.f32 0.33333334, %v387_v44 }
 0x1c1   :  { %v513_v48 = vpop.f32.mrf.mxu2 }
 0x1c2   :  { %v514_v49 = vadd.f32 %v868_v45, %v513_v48  ;;  %v390_v50 = vsub.f32 %v389_v46, %v388_v47  ;;  %v453_v51 = vsub.f32 %v1338_v36, %v388_v47  ;;  %v424_v55 = vsub.f32 %v423_v54, %v388_v47 }
 0x1c4   :  { %v516_v52 = vmax.f32 %v514_v49, 0.0  ;;  %v393_v53 = vsel %vm226_vm3, %v390_v50, -1e+30  ;;  %v425_v56 = vsel %vm226_vm3, %v424_v55, -1e+30 }
 0x1c5   :  { %394 = vmax.xlane.f32.xlu1 %v393_v53  ;;  %v454_v27 = vsel %vm226_vm3, %v453_v51, -1e+30 }
 0x1c6   :  { %843 = vmatmul.msk.f32.vlgmr.msrb.gmra.mxu3 %vm302_vm2, %v516_v52  ;;  %844 = vmatmul.msk.f32.vlgmr.msra.gmra.mxu0 %vm302_vm2, %v516_v52 }
 0x1c7   :  { %845 = vmatmul.msk.f32.vlgmr.msra.gmra.mxu1 %vm302_vm2, %v516_v52  ;;  %846 = vmatmul.msk.f32.vlgmr.msra.gmra.mxu2 %vm302_vm2, %v516_v52 }
 0x1cd   :  { %426 = vmax.xlane.f32.xlu1 %v425_v56 }
 0x1ce   :  { %847 = vmatmul.msk.f32.vlgmr.msra.gmra.mxu3 %vm302_vm2, %v516_v52 }
 0x238   :  { %v395_v57 = vpop.xlane.xlu1 %394 }
 0x239   :  { %v396_v29 = vsub.f32 %v393_v53, %v395_v57 }
 0x23b   :  { %v397_v31 = vmul.f32 1.442695, %v396_v29 }
 0x240   :  { %v427_v58 = vpop.xlane.xlu1 %426 }
 0x241   :  { %v428_v59 = vsub.f32 %v425_v56, %v427_v58 }
 0x243   :  { %v429_v60 = vmul.f32 1.442695, %v428_v59  ;;  %v609_v0 = vpop.f32.mrf.mxu0 }
 0x244   :  { %v629_v2 = vpop.f32.mrf.mxu1  ;;  %v610_v4 = vadd.f32 %v609_v0, %v560_v62 }
 0x245   :  { %870 = vpow2.f32 %v429_v60  ;;  %v630_v9 = vadd.f32 %v629_v2, %v561_v1 }
 0x246   :  { %872 = vpow2.f32 %v397_v31 }
 0x249   :  { %v589_v3 = vpop.f32.mrf.mxu3 }
 0x24a   :  { %v590_v5 = vadd.f32 %v589_v3, %v559_v63  ;;  %v649_v8 = vpop.f32.mrf.mxu2  ;;  %v1388_v3 = vld [vmem:[#allocation8] ss:$0 sm:$0xff] }
 0x24b   :  { %v1356_v7 = vpop.eup %870  ;;  %v650_v11 = vadd.f32 %v649_v8, %v562_v6 }
 0x24c   :  { %v672_v10 = vadd.f32 %v610_v4, %v590_v5  ;;  %431 = vadd.xlane.f32.xlu1 %v1356_v7  ;;  %v1369_v33 = vpop.eup %872 }
 0x24e   :  { %v673_v12 = vadd.f32 %v672_v10, %v630_v9 }
 0x250   :  { %v674_v14 = vadd.f32 %v673_v12, %v650_v11 }
 0x251   :  { %v669_v15 = vpop.f32.mrf.mxu3 }
 0x252   :  { %v670_v16 = vadd.f32 %v669_v15, %v563_v13  ;;  %v675_v17 = vmul.f32 0.25, %v674_v14 }
 0x254   :  { %v734_v18 = vadd.f32 %v670_v16, %v630_v9  ;;  %v676_v19 = vadd.f32 %v670_v16, %v590_v5  ;;  %v705_v24 = vadd.f32 %v670_v16, %v610_v4  ;;  %v763_v28 = vadd.f32 %v670_v16, %v650_v11 }
 0x256   :  { %v735_v20 = vsub.f32 %v734_v18, %v675_v17  ;;  %v677_v21 = vsub.f32 %v676_v19, %v675_v17  ;;  %v706_v25 = vsub.f32 %v705_v24, %v675_v17  ;;  %v764_v30 = vsub.f32 %v763_v28, %v675_v17 }
 0x258   :  { %v736_v22 = vsel %vm226_vm3, %v735_v20, -1e+30  ;;  %v678_v23 = vsel %vm226_vm3, %v677_v21, -1e+30  ;;  %v707_v26 = vsel %vm226_vm3, %v706_v25, -1e+30 }
 0x259   :  { %737 = vmax.xlane.f32.xlu2 %v736_v22  ;;  %679 = vmax.xlane.f32.xlu0 %v678_v23  ;;  %v765_v32 = vsel %vm226_vm3, %v764_v30, -1e+30 }
 0x261   :  { %708 = vmax.xlane.f32.xlu0 %v707_v26  ;;  %455 = vmax.xlane.f32.xlu2 %v454_v27 }
 0x269   :  { %766 = vmax.xlane.f32.xlu0 %v765_v32 }
 0x271   :  { %399 = vadd.xlane.f32.xlu0 %v1369_v33 }
 0x2bf   :  { %v432_v34 = vpop.xlane.xlu1 %431 }
 0x2c0   :  { %874 = vrcp.f32 %v432_v34  ;;  %v444_v54 = vand.u32 2147483648, %v432_v34  ;;  %vm438_vm5 = vweird.f32 %v432_v34  ;;  %v442_v56 = vand.u32 2147483647, %v432_v34 }
 0x2c2   :  { %v445_v61 = vor.u32 1.1754944e-38, %v444_v54  ;;  %vm443_vm7 = vcmp.eq.f32.partialorder %v442_v56, 8.507059e+37 }
 0x2c6   :  { %v875_v37 = vpop.eup %874 }
 0x2c7   :  { %v434_v40 = vmul.f32 %v875_v37, %v432_v34  ;;  %vm439_vm4 = vweird.f32 %v875_v37 }
 0x2c8   :  { %vm440_vm6 = vmor %vm438_vm5, %vm439_vm4 }
 0x2c9   :  { %v435_v41 = vsub.f32 1.0, %v434_v40 }
 0x2cb   :  { %v436_v49 = vmul.f32 %v875_v37, %v435_v41 }
 0x2cc   :  { %v738_v35 = vpop.xlane.xlu2 %737  ;;  %v680_v36 = vpop.xlane.xlu0 %679 }
 0x2cd   :  { %v681_v38 = vsub.f32 %v678_v23, %v680_v36  ;;  %v739_v50 = vsub.f32 %v736_v22, %v738_v35  ;;  %v437_v53 = vadd.f32 %v875_v37, %v436_v49 }
 0x2cf   :  { %v682_v39 = vmul.f32 1.442695, %v681_v38  ;;  %v740_v51 = vmul.f32 1.442695, %v739_v50  ;;  %v441_v60 = vsel %vm440_vm6, %v875_v37, %v437_v53 }
 0x2d0   :  { %v446_v62 = vsel %vm443_vm7, %v445_v61, %v441_v60 }
 0x2d1   :  { %876 = vpow2.f32 %v682_v39  ;;  %v447_v1 = vmul.f32 %v1356_v7, %v446_v62 }
 0x2d3   :  { %v448_v4 = vmax.f32 %v447_v1, 0.001 }
 0x2d4   :  { %v709_v42 = vpop.xlane.xlu0 %708  ;;  %v456_v44 = vpop.xlane.xlu2 %455 }
 0x2d5   :  { %v710_v43 = vsub.f32 %v707_v26, %v709_v42  ;;  %v457_v45 = vsub.f32 %v454_v27, %v456_v44  ;;  %v449_v9 = vmul.f32 %v1388_v3, %v448_v4 }
 0x2d7   :  { %v711_v46 = vmul.f32 1.442695, %v710_v43  ;;  %v458_v47 = vmul.f32 1.442695, %v457_v45  ;;  %v1372_v48 = vpop.eup %876 }
 0x2d8   :  { %684 = vadd.xlane.f32.xlu1 %v1372_v48 }
 0x2d9   :  { %878 = vpow2.f32 %v711_v46 }
 0x2da   :  { %880 = vpow2.f32 %v458_v47 }
 0x2db   :  { %882 = vpow2.f32 %v740_v51 }
 0x2dc   :  { %v767_v52 = vpop.xlane.xlu0 %766 }
 0x2dd   :  { %v768_v55 = vsub.f32 %v765_v32, %v767_v52 }
 0x2df   :  { %v1375_v57 = vpop.eup %878  ;;  %v769_v58 = vmul.f32 1.442695, %v768_v55 }
 0x2e0   :  { %v1377_v59 = vpop.eup %880  ;;  %713 = vadd.xlane.f32.xlu2 %v1375_v57 }
 0x2e1   :  { %884 = vpow2.f32 %v769_v58  ;;  %460 = vadd.xlane.f32.xlu0 %v1377_v59  ;;  %v1381_v0 = vpop.eup %882 }
 0x2e4   :  { %v400_v63 = vpop.xlane.xlu0 %399 }
 0x2e5   :  { %886 = vrcp.f32 %v400_v63  ;;  %v412_v10 = vand.u32 2147483648, %v400_v63  ;;  %v410_v12 = vand.u32 2147483647, %v400_v63  ;;  %vm406_vm9 = vweird.f32 %v400_v63 }
 0x2e7   :  { %v1384_v2 = vpop.eup %884  ;;  %v413_v13 = vor.u32 1.1754944e-38, %v412_v10  ;;  %vm411_vm11 = vcmp.eq.f32.partialorder %v410_v12, 8.507059e+37 }
 0x2e8   :  { %742 = vadd.xlane.f32.xlu2 %v1381_v0  ;;  %771 = vadd.xlane.f32.xlu1 %v1384_v2 }
 0x2eb   :  { %v887_v5 = vpop.eup %886 }
 0x2ec   :  { %v402_v6 = vmul.f32 %v887_v5, %v400_v63  ;;  %vm407_vm8 = vweird.f32 %v887_v5 }
 0x2ed   :  { %vm408_vm10 = vmor %vm406_vm9, %vm407_vm8 }
 0x2ee   :  { %v403_v8 = vsub.f32 1.0, %v402_v6 }
 0x2f0   :  { %v404_v11 = vmul.f32 %v887_v5, %v403_v8  ;;  %450 = vadd.xlane.f32.xlu2 %v449_v9 }
 0x2f2   :  { %v405_v7 = vadd.f32 %v887_v5, %v404_v11 }
 0x2f4   :  { %v409_v14 = vsel %vm408_vm10, %v887_v5, %v405_v7 }
 0x2f5   :  { %v414_v15 = vsel %vm411_vm11, %v413_v13, %v409_v14 }
 0x2f6   :  { %v415_v16 = vmul.f32 %v1369_v33, %v414_v15 }
 0x2f8   :  { %v416_v17 = vmax.f32 %v415_v16, 0.001 }
 0x2fa   :  { %v420_v18 = vmul.f32 %v1388_v3, %v416_v17 }
 0x2fc   :  { %421 = vadd.xlane.f32.xlu1 %v420_v18 }
 0x34b   :  { %v685_v19 = vpop.xlane.xlu1 %684 }
 0x34c   :  { %888 = vrcp.f32 %v685_v19  ;;  %v697_v26 = vand.u32 2147483648, %v685_v19  ;;  %v695_v27 = vand.u32 2147483647, %v685_v19  ;;  %vm691_vm13 = vweird.f32 %v685_v19 }
 0x34e   :  { %v698_v34 = vor.u32 1.1754944e-38, %v697_v26  ;;  %vm696_vm15 = vcmp.eq.f32.partialorder %v695_v27, 8.507059e+37 }
 0x352   :  { %v889_v20 = vpop.eup %888 }
 0x353   :  { %v714_v21 = vpop.xlane.xlu2 %713  ;;  %v687_v22 = vmul.f32 %v889_v20, %v685_v19  ;;  %vm692_vm12 = vweird.f32 %v889_v20 }
 0x354   :  { %890 = vrcp.f32 %v714_v21  ;;  %v461_v23 = vpop.xlane.xlu0 %460  ;;  %v726_v37 = vand.u32 2147483648, %v714_v21  ;;  %vm693_vm14 = vmor %vm691_vm13, %vm692_vm12  ;;  %v724_v41 = vand.u32 2147483647, %v714_v21  ;;  %vm720_vm2 = vweird.f32 %v714_v21 }
 0x355   :  { %892 = vrcp.f32 %v461_v23  ;;  %v688_v24 = vsub.f32 1.0, %v687_v22  ;;  %v473_v39 = vand.u32 2147483648, %v461_v23  ;;  %v471_v43 = vand.u32 2147483647, %v461_v23 }
 0x356   :  { %vm467_vm3 = vweird.f32 %v461_v23  ;;  %v727_v50 = vor.u32 1.1754944e-38, %v726_v37  ;;  %vm725_vm5 = vcmp.eq.f32.partialorder %v724_v41, 8.507059e+37 }
 0x357   :  { %v689_v25 = vmul.f32 %v889_v20, %v688_v24  ;;  %v474_v51 = vor.u32 1.1754944e-38, %v473_v39  ;;  %vm472_vm7 = vcmp.eq.f32.partialorder %v471_v43, 8.507059e+37 }
 0x359   :  { %v690_v29 = vadd.f32 %v889_v20, %v689_v25 }
 0x35a   :  { %v891_v28 = vpop.eup %890 }
 0x35b   :  { %v893_v30 = vpop.eup %892  ;;  %v716_v31 = vmul.f32 %v891_v28, %v714_v21  ;;  %v1393_v32 = vpop.xlane.xlu2 %742  ;;  %v694_v40 = vsel %vm693_vm14, %v889_v20, %v690_v29  ;;  %vm721_vm0 = vweird.f32 %v891_v28 }
 0x35c   :  { %v1395_v33 = vpop.xlane.xlu1 %771  ;;  %v463_v35 = vmul.f32 %v893_v30, %v461_v23  ;;  %894 = vrcp.f32 %v1393_v32  ;;  %v699_v44 = vsel %vm696_vm15, %v698_v34, %v694_v40  ;;  %vm468_vm1 = vweird.f32 %v893_v30  ;;  %vm722_vm4 = vmor %vm720_vm2, %vm721_vm0 }
 0x35d   :  { %v717_v36 = vsub.f32 1.0, %v716_v31  ;;  %896 = vrcp.f32 %v1395_v33  ;;  %v700_v46 = vmul.f32 %v1372_v48, %v699_v44  ;;  %vm469_vm6 = vmor %vm467_vm3, %vm468_vm1  ;;  %v755_v4 = vand.u32 2147483648, %v1393_v32 }
 0x35e   :  { %v464_v38 = vsub.f32 1.0, %v463_v35  ;;  %v784_v6 = vand.u32 2147483648, %v1395_v33  ;;  %v753_v11 = vand.u32 2147483647, %v1393_v32  ;;  %v782_v13 = vand.u32 2147483647, %v1395_v33 }
 0x35f   :  { %v718_v42 = vmul.f32 %v891_v28, %v717_v36  ;;  %v701_v52 = vmax.f32 %v700_v46, 0.001  ;;  %vm749_vm10 = vweird.f32 %v1393_v32  ;;  %v756_v15 = vor.u32 1.1754944e-38, %v755_v4 }
 0x360   :  { %v465_v45 = vmul.f32 %v893_v30, %v464_v38  ;;  %vm778_vm11 = vweird.f32 %v1395_v33  ;;  %v785_v17 = vor.u32 1.1754944e-38, %v784_v6  ;;  %vm754_vm13 = vcmp.eq.f32.partialorder %v753_v11, 8.507059e+37 }
 0x361   :  { %v719_v47 = vadd.f32 %v891_v28, %v718_v42  ;;  %v702_v48 = vmul.f32 %v1388_v3, %v701_v52  ;;  %vm783_vm15 = vcmp.eq.f32.partialorder %v782_v13, 8.507059e+37  ;;  %vm481_vm0 = vcmask 7168  }
 0x362   :  { %v895_v49 = vpop.eup %894  ;;  %v466_v53 = vadd.f32 %v893_v30, %v465_v45  ;;  %vm483_vm1 = vcmask 15360   ;;  %vm485_vm2 = vcmask 23552   ;;  %vm795_vm3 = vcmask 31744  }
 0x363   :  { %v897_v54 = vpop.eup %896  ;;  %v745_v55 = vmul.f32 %v895_v49, %v1393_v32  ;;  %v723_v56 = vsel %vm722_vm4, %v891_v28, %v719_v47  ;;  %703 = vadd.xlane.f32.xlu2 %v702_v48  ;;  %vm750_vm8 = vweird.f32 %v895_v49  ;;  %v451_v28 = vpop.xlane.xlu2 %450 }
 0x364   :  { %v774_v58 = vmul.f32 %v897_v54, %v1395_v33  ;;  %v728_v60 = vsel %vm725_vm5, %v727_v50, %v723_v56  ;;  %v470_v61 = vsel %vm469_vm6, %v893_v30, %v466_v53  ;;  %vm779_vm9 = vweird.f32 %v897_v54  ;;  %vm751_vm12 = vmor %vm749_vm10, %vm750_vm8 }
 0x365   :  { %v746_v62 = vsub.f32 1.0, %v745_v55  ;;  %v729_v63 = vmul.f32 %v1375_v57, %v728_v60  ;;  %v475_v1 = vsel %vm472_vm7, %v474_v51, %v470_v61  ;;  %vm780_vm14 = vmor %vm778_vm11, %vm779_vm9 }
 0x366   :  { %v775_v5 = vsub.f32 1.0, %v774_v58  ;;  %v476_v8 = vmul.f32 %v1377_v59, %v475_v1 }
 0x367   :  { %v747_v9 = vmul.f32 %v895_v49, %v746_v62  ;;  %v730_v10 = vmax.f32 %v729_v63, 0.001 }
 0x368   :  { %v776_v12 = vmul.f32 %v897_v54, %v775_v5  ;;  %v477_v7 = vmax.f32 %v476_v8, 0.001 }
 0x369   :  { %v731_v57 = vmul.f32 %v1388_v3, %v730_v10  ;;  %v748_v14 = vadd.f32 %v895_v49, %v747_v9 }
 0x36a   :  { %v478_v59 = vmul.f32 %v1388_v3, %v477_v7  ;;  %v777_v16 = vadd.f32 %v897_v54, %v776_v12 }
 0x36b   :  { %732 = vadd.xlane.f32.xlu0 %v731_v57  ;;  %v752_v18 = vsel %vm751_vm12, %v895_v49, %v748_v14 }
 0x36c   :  { %479 = vadd.xlane.f32.xlu1 %v478_v59  ;;  %v757_v19 = vsel %vm754_vm13, %v756_v15, %v752_v18  ;;  %v781_v20 = vsel %vm780_vm14, %v897_v54, %v777_v16 }
 0x36d   :  { %v758_v21 = vmul.f32 %v1381_v0, %v757_v19  ;;  %v786_v22 = vsel %vm783_vm15, %v785_v17, %v781_v20 }
 0x36e   :  { %v787_v23 = vmul.f32 %v1384_v2, %v786_v22 }
 0x36f   :  { %v759_v24 = vmax.f32 %v758_v21, 0.001  ;;  %v422_v29 = vpop.xlane.xlu1 %421 }
 0x370   :  { %v788_v25 = vmax.f32 %v787_v23, 0.001  ;;  %v482_v2 = vsel %vm481_vm0, %v422_v29, %v451_v28 }
 0x371   :  { %v760_v26 = vmul.f32 %v1388_v3, %v759_v24 }
 0x372   :  { %v789_v27 = vmul.f32 %v1388_v3, %v788_v25 }
 0x373   :  { %761 = vadd.xlane.f32.xlu0 %v760_v26 }
 0x374   :  { %790 = vadd.xlane.f32.xlu2 %v789_v27 }
 0x3d6   :  { %v704_v30 = vpop.xlane.xlu2 %703 }
 0x3de   :  { %v733_v0 = vpop.xlane.xlu0 %732 }
 0x3df   :  { %v480_v31 = vpop.xlane.xlu1 %479  ;;  %v792_v33 = vsel %vm481_vm0, %v704_v30, %v733_v0 }
 0x3e0   :  { %v484_v3 = vsel %vm483_vm1, %v482_v2, %v480_v31 }
 0x3e1   :  { %v486_v32 = vsel %vm485_vm2, %v484_v3, 0.0 }
 0x3e2   :  { %487 = vst [vmem:[#allocation19] sm:$0xff] %v486_v32 }
 0x3e3   :  { %808 = dma.vmem_to_hbm [thread:$0]  %s804_s1, 128, %s806_s22, [#allocation4]  }
 0x3e6   :  { %v762_v34 = vpop.xlane.xlu0 %761 }
 0x3e7   :  { %v793_v35 = vsel %vm483_vm1, %v792_v33, %v762_v34  ;;  %v791_v36 = vpop.xlane.xlu2 %790 }
 0x3e8   :  { %v794_v37 = vsel %vm485_vm2, %v793_v35, %v791_v36 }
 0x3e9   :  { %v796_v38 = vsel %vm795_vm3, %v794_v37, 0.0 }
 0x3ea   :  { %797 = vst [vmem:[#allocation20] sm:$0xff] %v796_v38 }
 0x3eb   :  { %819 = dma.vmem_to_hbm [thread:$0]  %s815_s3, 128, %s817_s12, [#allocation21]  }
 0x3ec   :  { %1198 = dma.done.wait [#allocation4], 128  }
 0x3ed   :  { %1199 = vsyncadd [#allocation4], 4294967168 }
 0x3ee   :  { %1200 = dma.done.wait [#allocation21], 128  }
 0x3ef   :  { %1201 = vsyncadd [#allocation21], 4294967168 }
 0x3f0   :  { %828 = vsyncpa [#allocation3], 1 }
 0x3f1   :  { %829 = vsyncpa [#allocation6], 1 }
 0x3f2   :  { %830 = vsyncpa [#allocation9], 1 }
 0x3f3   :  { %831 = vsyncpa [#allocation12], 1 }
 0x3f4   :  { %832 = vsyncpa [#allocation15], 1 }
 0x3f5   :  { %833 = vsyncpa [#allocation18], 1 }
 0x3f6   :  { %834 = vsyncpa [#allocation4], 1 }
 0x3f7   :  { %835 = vsyncpa [#allocation21], 1 }

</bundles_post_ra>
